<compile_context>
chip_gen: v7x
topology: tpu7x:2x2x1
jax: 0.10.0
libtpu: 0.0.40
codegen_flags: <defaults>
</compile_context>

<pallas_src>
import jax
import jax.numpy as jnp
from jax.experimental import pallas as pl
from jax.experimental.pallas import tpu as pltpu

IN_FEATURES = 784
HID1 = 256
HID2 = 128
HID3_PAD = 128          # fc3 real output is 64, padded to a full 128-lane vreg
NUM_CLASSES = 10
OUT_PAD = 128           # lane-dense padded logits width
NEG_BIG = -1e30         # padded logit columns; exp() underflows to exactly 0
BN_EPS = 1e-5
DEFAULT_TILE_N = 1024   # big tiles amortize ~0.35us/grid-step overhead


def _round_up(v, m):
    return ((v + m - 1) // m) * m


def _choose_tile(n, tile_n):
    # Small batches: one full-extent block (no alignment constraint, no grid loop).
    if n <= 256:
        return n
    # Larger batches: biggest tile that still gives >= 2 blocks (so the batch
    # axis can shard across v7x's two TensorCores); keep 16-row alignment for
    # clean bf16/f32 sublane tiling of the partial blocks.
    half = -(-n // 2)
    return min(tile_n, _round_up(half, 16))


def mlp_kernel(x_ref,
               w1_ref, b1_ref,
               w2_ref, b2_ref,
               w3_ref, b3_ref,
               w4_ref, b4_ref,
               out_ref):
    # Cast to bf16 in-kernel (input arrives in producer dtype, usually f32).
    x = x_ref[...].astype(jnp.bfloat16)                              # (T, 784)

    # fc1 (BatchNorm folded into w1/b1), ReLU.
    h = jnp.dot(x, w1_ref[...], preferred_element_type=jnp.float32) + b1_ref[...]
    # TODO(synk): Dropout(p=0.2) is identity in eval mode; training-mode RNG
    # masks (matching torch's RNG stream) are not reproduced here.
    h = jnp.maximum(h, 0.0).astype(jnp.bfloat16)                     # (T, 256)

    # fc2: 256 -> 128, ReLU
    h = jnp.dot(h, w2_ref[...], preferred_element_type=jnp.float32) + b2_ref[...]
    h = jnp.maximum(h, 0.0).astype(jnp.bfloat16)                     # (T, 128)

    # fc3: 128 -> 64 (padded to 128 with zero weights/bias), ReLU keeps pads 0.
    h = jnp.dot(h, w3_ref[...], preferred_element_type=jnp.float32) + b3_ref[...]
    h = jnp.maximum(h, 0.0).astype(jnp.bfloat16)                     # (T, 128)

    # fc4: 128 (padded) -> 128 (padded); padded columns carry NEG_BIG bias.
    logits = jnp.dot(h, w4_ref[...], preferred_element_type=jnp.float32) + b4_ref[...]

    # log_softmax over the lane dim; padded columns contribute exp(...) == 0.
    m = jnp.max(logits, axis=1, keepdims=True)
    shifted = logits - m
    lse = jnp.log(jnp.sum(jnp.exp(shifted), axis=1, keepdims=True))
    out_ref[...] = (shifted - lse).astype(out_ref.dtype)             # bf16 writeback


def _prepare_params(params):
    """Fold BN into fc1, cast weights to bf16, lane-pad fc3/fc4."""
    scale = params["bn_gamma"] * jax.lax.rsqrt(params["bn_var"] + BN_EPS)   # (1, 256)
    w1 = (params["w1"] * scale).astype(jnp.bfloat16)                        # (784, 256)
    b1 = (params["b1"] - params["bn_mean"]) * scale + params["bn_beta"]     # (1, 256) f32

    w2 = params["w2"].astype(jnp.bfloat16)                                  # (256, 128)
    b2 = params["b2"]

    # fc3 output padded 64 -> 128 with zeros; ReLU(0*x + 0) == 0 in the pads.
    w3 = jnp.zeros((HID2, HID3_PAD), jnp.bfloat16)
    w3 = w3.at[:, :64].set(params["w3"].astype(jnp.bfloat16))
    b3 = jnp.zeros((1, HID3_PAD), jnp.float32).at[:, :64].set(params["b3"])

    # fc4 input padded 64 -> 128 (zero rows), output padded 10 -> 128
    # (zero weight columns + NEG_BIG bias so log_softmax ignores them).
    w4 = jnp.zeros((HID3_PAD, OUT_PAD), jnp.bfloat16)
    w4 = w4.at[:64, :NUM_CLASSES].set(params["w4"].astype(jnp.bfloat16))
    b4 = jnp.full((1, OUT_PAD), NEG_BIG, jnp.float32)
    b4 = b4.at[:, :NUM_CLASSES].set(params["b4"])

    return w1, b1, w2, b2, w3, b3, w4, b4


def network_forward(x_nchw, params, tile_n=DEFAULT_TILE_N):
    n = x_nchw.shape[0]
    x2d = x_nchw.reshape(n, -1)                      # free reshape; no dtype/pad pass
    assert x2d.shape[1] == IN_FEATURES, x2d.shape

    w1, b1, w2, b2, w3, b3, w4, b4 = _prepare_params(params)

    t = _choose_tile(n, tile_n)
    grid = (pl.cdiv(n, t),)                          # ragged last block: reads are
                                                     # unspecified, writes dropped
    batch_map = lambda i: (i, 0)
    const_map = lambda i: (0, 0)

    in_specs = [
        pl.BlockSpec((t, IN_FEATURES), batch_map),                                # x tile
        pl.BlockSpec((IN_FEATURES, HID1), const_map), pl.BlockSpec((1, HID1), const_map),  # fc1 (BN folded)
        pl.BlockSpec((HID1, HID2), const_map), pl.BlockSpec((1, HID2), const_map),         # fc2
        pl.BlockSpec((HID2, HID3_PAD), const_map), pl.BlockSpec((1, HID3_PAD), const_map), # fc3 (padded)
        pl.BlockSpec((HID3_PAD, OUT_PAD), const_map), pl.BlockSpec((1, OUT_PAD), const_map),  # fc4 (padded)
    ]
    out_spec = pl.BlockSpec((t, OUT_PAD), batch_map)

    # Advisory cost estimate for XLA scheduling.
    mm = IN_FEATURES * HID1 + HID1 * HID2 + HID2 * HID3_PAD + HID3_PAD * OUT_PAD
    x_bytes = int(jnp.dtype(x2d.dtype).itemsize)
    cost = pl.CostEstimate(
        flops=int(2 * n * mm),
        transcendentals=int(n * (OUT_PAD + 1)),
        bytes_accessed=int(n * (IN_FEATURES * x_bytes + OUT_PAD * 2) + 2 * mm + 4 * 1024),
    )

    out = pl.pallas_call(
        mlp_kernel,
        out_shape=jax.ShapeDtypeStruct((n, OUT_PAD), jnp.bfloat16),
        grid=grid,
        in_specs=in_specs,
        out_specs=out_spec,
        compiler_params=pltpu.CompilerParams(
            dimension_semantics=("parallel",),
            vmem_limit_bytes=32 * 1024 * 1024),      # headroom for f32 x tiles on v5e
        cost_estimate=cost,
    )(x2d, w1, b1, w2, b2, w3, b3, w4, b4)

    return out[:, :NUM_CLASSES]                      # bf16 log-probs of the 10 classes


def init_params(key):
    # Deterministic init (PyTorch-shape-compatible); weights stored transposed
    # as (in, out). Biases / BN params kept 2D (1, C) for clean TPU layouts.
    ks = jax.random.split(key, 8)

    def linear(kw, kb, fan_in, fan_out):
        bound = 1.0 / jnp.sqrt(jnp.float32(fan_in))
        w = jax.random.uniform(kw, (fan_in, fan_out), jnp.float32, -bound, bound)
        b = jax.random.uniform(kb, (1, fan_out), jnp.float32, -bound, bound)
        return w, b

    w1, b1 = linear(ks[0], ks[1], 784, 256)
    w2, b2 = linear(ks[2], ks[3], 256, 128)
    w3, b3 = linear(ks[4], ks[5], 128, 64)
    w4, b4 = linear(ks[6], ks[7], 64, 10)

    return {
        "w1": w1, "b1": b1,
        # BatchNorm1d(256) default init: gamma=1, beta=0, running_mean=0, running_var=1
        "bn_gamma": jnp.ones((1, 256), jnp.float32),
        "bn_beta": jnp.zeros((1, 256), jnp.float32),
        "bn_mean": jnp.zeros((1, 256), jnp.float32),
        "bn_var": jnp.ones((1, 256), jnp.float32),
        "w2": w2, "b2": b2,
        "w3": w3, "b3": b3,
        "w4": w4, "b4": b4,
    }


def reference_forward(x_nchw, params):
    # Pure-JAX f32 reference of the eval-mode PyTorch forward.
    n = x_nchw.shape[0]
    x = x_nchw.reshape(n, -1).astype(jnp.float32)
    h = x @ params["w1"] + params["b1"]
    h = ((h - params["bn_mean"]) * jax.lax.rsqrt(params["bn_var"] + BN_EPS)
         * params["bn_gamma"] + params["bn_beta"])
    h = jnp.maximum(h, 0.0)
    h = jnp.maximum(h @ params["w2"] + params["b2"], 0.0)
    h = jnp.maximum(h @ params["w3"] + params["b3"], 0.0)
    logits = h @ params["w4"] + params["b4"]
    return jax.nn.log_softmax(logits, axis=1)


def _check(x, params, row_tol=2e-2, abs_tol=0.15):
    out = jax.block_until_ready(network_forward(x, params))
    assert out.shape == (x.shape[0], NUM_CLASSES), out.shape
    out_f32 = out.astype(jnp.float32)
    row_sums = jnp.sum(jnp.exp(out_f32), axis=1)
    assert bool(jnp.all(jnp.abs(row_sums - 1.0) < row_tol)), row_sums
    ref = reference_forward(x, params)
    err = float(jnp.max(jnp.abs(out_f32 - ref)))
    assert err < abs_tol, err
    return out


if __name__ == "__main__":
    key = jax.random.PRNGKey(0)
    k_x1, k_x2, k_p = jax.random.split(key, 3)
    params = init_params(k_p)

    # Small MNIST-like batch: NCHW (8, 1, 28, 28) — single full-extent block.
    x_small = jax.random.normal(k_x1, (8, 1, 28, 28), jnp.float32)
    _check(x_small, params)

    # Non-multiple batch exercising the ragged 2-block grid path.
    x_ragged = jax.random.normal(k_x2, (300, 1, 28, 28), jnp.float32)
    _check(x_ragged, params)

    print("KERNEL_OK")
</pallas_src>

<mosaic_0001>
module attributes {stable_mosaic.version = 11 : i64} {
  func.func @mlp_kernel(%arg0: i32, %arg1: memref<8x784xf32, #tpu.memory_space<vmem>>, %arg2: memref<784x256xbf16, #tpu.memory_space<vmem>>, %arg3: memref<1x256xf32, #tpu.memory_space<vmem>>, %arg4: memref<256x128xbf16, #tpu.memory_space<vmem>>, %arg5: memref<1x128xf32, #tpu.memory_space<vmem>>, %arg6: memref<128x128xbf16, #tpu.memory_space<vmem>>, %arg7: memref<1x128xf32, #tpu.memory_space<vmem>>, %arg8: memref<128x128xbf16, #tpu.memory_space<vmem>>, %arg9: memref<1x128xf32, #tpu.memory_space<vmem>>, %arg10: memref<8x128xbf16, #tpu.memory_space<vmem>>) attributes {dimension_semantics = [#tpu.dimension_semantics<parallel>], iteration_bounds = array<i64: 1>, scalar_prefetch = 0 : i64, scratch_operands = 0 : i64, tpu.core_type = #tpu.core_type<tc>, window_params = [{transform_indices = @transform_0, window_bounds = array<i64: 8, 784>}, {pipeline_mode = #tpu.pipeline_mode<synchronous>, transform_indices = @transform_1, window_bounds = array<i64: 784, 256>}, {pipeline_mode = #tpu.pipeline_mode<synchronous>, transform_indices = @transform_2, window_bounds = array<i64: 1, 256>}, {pipeline_mode = #tpu.pipeline_mode<synchronous>, transform_indices = @transform_3, window_bounds = array<i64: 256, 128>}, {pipeline_mode = #tpu.pipeline_mode<synchronous>, transform_indices = @transform_4, window_bounds = array<i64: 1, 128>}, {pipeline_mode = #tpu.pipeline_mode<synchronous>, transform_indices = @transform_5, window_bounds = array<i64: 128, 128>}, {pipeline_mode = #tpu.pipeline_mode<synchronous>, transform_indices = @transform_6, window_bounds = array<i64: 1, 128>}, {pipeline_mode = #tpu.pipeline_mode<synchronous>, transform_indices = @transform_7, window_bounds = array<i64: 128, 128>}, {pipeline_mode = #tpu.pipeline_mode<synchronous>, transform_indices = @transform_8, window_bounds = array<i64: 1, 128>}, {transform_indices = @transform_9, window_bounds = array<i64: 8, 128>}]} {
    %c0 = arith.constant 0 : index
    %c0_0 = arith.constant 0 : index
    %0 = vector.load %arg1[%c0, %c0_0] : memref<8x784xf32, #tpu.memory_space<vmem>>, vector<8x784xf32>
    %1 = arith.truncf %0 : vector<8x784xf32> to vector<8x784xbf16>
    %c0_1 = arith.constant 0 : index
    %c0_2 = arith.constant 0 : index
    %2 = vector.load %arg2[%c0_1, %c0_2] : memref<784x256xbf16, #tpu.memory_space<vmem>>, vector<784x256xbf16>
    %cst = arith.constant dense<0.000000e+00> : vector<8x256xf32>
    %3 = tpu.matmul %1, %2, %cst {dimension_numbers = #tpu.dot_dimension_numbers<[1], [0], [0], [1], [0, 0, 1, 1], [], []>} : vector<8x784xbf16>, vector<784x256xbf16>, vector<8x256xf32> -> vector<8x256xf32>
    %c0_3 = arith.constant 0 : index
    %c0_4 = arith.constant 0 : index
    %4 = vector.load %arg3[%c0_3, %c0_4] : memref<1x256xf32, #tpu.memory_space<vmem>>, vector<1x256xf32>
    %5 = vector.broadcast %4 : vector<1x256xf32> to vector<8x256xf32>
    %6 = arith.addf %3, %5 : vector<8x256xf32>
    %cst_5 = arith.constant 0.000000e+00 : f32
    %7 = vector.broadcast %cst_5 : f32 to vector<8x256xf32>
    %8 = arith.maximumf %6, %7 : vector<8x256xf32>
    %9 = arith.truncf %8 : vector<8x256xf32> to vector<8x256xbf16>
    %c0_6 = arith.constant 0 : index
    %c0_7 = arith.constant 0 : index
    %10 = vector.load %arg4[%c0_6, %c0_7] : memref<256x128xbf16, #tpu.memory_space<vmem>>, vector<256x128xbf16>
    %cst_8 = arith.constant dense<0.000000e+00> : vector<8x128xf32>
    %11 = tpu.matmul %9, %10, %cst_8 {dimension_numbers = #tpu.dot_dimension_numbers<[1], [0], [0], [1], [0, 0, 1, 1], [], []>} : vector<8x256xbf16>, vector<256x128xbf16>, vector<8x128xf32> -> vector<8x128xf32>
    %c0_9 = arith.constant 0 : index
    %c0_10 = arith.constant 0 : index
    %12 = vector.load %arg5[%c0_9, %c0_10] : memref<1x128xf32, #tpu.memory_space<vmem>>, vector<1x128xf32>
    %13 = vector.broadcast %12 : vector<1x128xf32> to vector<8x128xf32>
    %14 = arith.addf %11, %13 : vector<8x128xf32>
    %cst_11 = arith.constant 0.000000e+00 : f32
    %15 = vector.broadcast %cst_11 : f32 to vector<8x128xf32>
    %16 = arith.maximumf %14, %15 : vector<8x128xf32>
    %17 = arith.truncf %16 : vector<8x128xf32> to vector<8x128xbf16>
    %c0_12 = arith.constant 0 : index
    %c0_13 = arith.constant 0 : index
    %18 = vector.load %arg6[%c0_12, %c0_13] : memref<128x128xbf16, #tpu.memory_space<vmem>>, vector<128x128xbf16>
    %cst_14 = arith.constant dense<0.000000e+00> : vector<8x128xf32>
    %19 = tpu.matmul %17, %18, %cst_14 {dimension_numbers = #tpu.dot_dimension_numbers<[1], [0], [0], [1], [0, 0, 1, 1], [], []>} : vector<8x128xbf16>, vector<128x128xbf16>, vector<8x128xf32> -> vector<8x128xf32>
    %c0_15 = arith.constant 0 : index
    %c0_16 = arith.constant 0 : index
    %20 = vector.load %arg7[%c0_15, %c0_16] : memref<1x128xf32, #tpu.memory_space<vmem>>, vector<1x128xf32>
    %21 = vector.broadcast %20 : vector<1x128xf32> to vector<8x128xf32>
    %22 = arith.addf %19, %21 : vector<8x128xf32>
    %cst_17 = arith.constant 0.000000e+00 : f32
    %23 = vector.broadcast %cst_17 : f32 to vector<8x128xf32>
    %24 = arith.maximumf %22, %23 : vector<8x128xf32>
    %25 = arith.truncf %24 : vector<8x128xf32> to vector<8x128xbf16>
    %c0_18 = arith.constant 0 : index
    %c0_19 = arith.constant 0 : index
    %26 = vector.load %arg8[%c0_18, %c0_19] : memref<128x128xbf16, #tpu.memory_space<vmem>>, vector<128x128xbf16>
    %cst_20 = arith.constant dense<0.000000e+00> : vector<8x128xf32>
    %27 = tpu.matmul %25, %26, %cst_20 {dimension_numbers = #tpu.dot_dimension_numbers<[1], [0], [0], [1], [0, 0, 1, 1], [], []>} : vector<8x128xbf16>, vector<128x128xbf16>, vector<8x128xf32> -> vector<8x128xf32>
    %c0_21 = arith.constant 0 : index
    %c0_22 = arith.constant 0 : index
    %28 = vector.load %arg9[%c0_21, %c0_22] : memref<1x128xf32, #tpu.memory_space<vmem>>, vector<1x128xf32>
    %29 = vector.broadcast %28 : vector<1x128xf32> to vector<8x128xf32>
    %30 = arith.addf %27, %29 : vector<8x128xf32>
    %cst_23 = arith.constant dense<0xFF800000> : vector<8xf32>
    %31 = vector.multi_reduction <maximumf>, %30, %cst_23 [1] : vector<8x128xf32> to vector<8xf32>
    %32 = vector.shape_cast %31 : vector<8xf32> to vector<8x1xf32>
    %33 = vector.broadcast %32 : vector<8x1xf32> to vector<8x128xf32>
    %34 = arith.subf %30, %33 : vector<8x128xf32>
    %35 = math.exp %34 : vector<8x128xf32>
    %cst_24 = arith.constant dense<0.000000e+00> : vector<8xf32>
    %36 = vector.multi_reduction <add>, %35, %cst_24 [1] : vector<8x128xf32> to vector<8xf32>
    %37 = vector.shape_cast %36 : vector<8xf32> to vector<8x1xf32>
    %38 = math.log %37 : vector<8x1xf32>
    %39 = vector.broadcast %38 : vector<8x1xf32> to vector<8x128xf32>
    %40 = arith.subf %34, %39 : vector<8x128xf32>
    %41 = arith.truncf %40 : vector<8x128xf32> to vector<8x128xbf16>
    %c0_25 = arith.constant 0 : index
    %c0_26 = arith.constant 0 : index
    %42 = vector.load %arg10[%c0_25, %c0_26] : memref<8x128xbf16, #tpu.memory_space<vmem>>, vector<8x128xbf16>
    tpu.vector_store %arg10[%c0_25, %c0_26], %41 {strides = array<i32>} : memref<8x128xbf16, #tpu.memory_space<vmem>>, vector<8x128xbf16>,
    return
  }
  func.func @transform_0(%arg0: i32) -> (i32, i32) {
    %c0_i32 = arith.constant 0 : i32
    %c0_i32_0 = arith.constant 0 : i32
    return %arg0, %c0_i32 : i32, i32
  }
  func.func @transform_1(%arg0: i32) -> (i32, i32) {
    %c0_i32 = arith.constant 0 : i32
    %c0_i32_0 = arith.constant 0 : i32
    %c0_i32_1 = arith.constant 0 : i32
    return %c0_i32, %c0_i32_0 : i32, i32
  }
  func.func @transform_2(%arg0: i32) -> (i32, i32) {
    %c0_i32 = arith.constant 0 : i32
    %c0_i32_0 = arith.constant 0 : i32
    %c0_i32_1 = arith.constant 0 : i32
    return %c0_i32, %c0_i32_0 : i32, i32
  }
  func.func @transform_3(%arg0: i32) -> (i32, i32) {
    %c0_i32 = arith.constant 0 : i32
    %c0_i32_0 = arith.constant 0 : i32
    %c0_i32_1 = arith.constant 0 : i32
    return %c0_i32, %c0_i32_0 : i32, i32
  }
  func.func @transform_4(%arg0: i32) -> (i32, i32) {
    %c0_i32 = arith.constant 0 : i32
    %c0_i32_0 = arith.constant 0 : i32
    %c0_i32_1 = arith.constant 0 : i32
    return %c0_i32, %c0_i32_0 : i32, i32
  }
  func.func @transform_5(%arg0: i32) -> (i32, i32) {
    %c0_i32 = arith.constant 0 : i32
    %c0_i32_0 = arith.constant 0 : i32
    %c0_i32_1 = arith.constant 0 : i32
    return %c0_i32, %c0_i32_0 : i32, i32
  }
  func.func @transform_6(%arg0: i32) -> (i32, i32) {
    %c0_i32 = arith.constant 0 : i32
    %c0_i32_0 = arith.constant 0 : i32
    %c0_i32_1 = arith.constant 0 : i32
    return %c0_i32, %c0_i32_0 : i32, i32
  }
  func.func @transform_7(%arg0: i32) -> (i32, i32) {
    %c0_i32 = arith.constant 0 : i32
    %c0_i32_0 = arith.constant 0 : i32
    %c0_i32_1 = arith.constant 0 : i32
    return %c0_i32, %c0_i32_0 : i32, i32
  }
  func.func @transform_8(%arg0: i32) -> (i32, i32) {
    %c0_i32 = arith.constant 0 : i32
    %c0_i32_0 = arith.constant 0 : i32
    %c0_i32_1 = arith.constant 0 : i32
    return %c0_i32, %c0_i32_0 : i32, i32
  }
  func.func @transform_9(%arg0: i32) -> (i32, i32) {
    %c0_i32 = arith.constant 0 : i32
    %c0_i32_0 = arith.constant 0 : i32
    return %arg0, %c0_i32 : i32, i32
  }
}

</mosaic_0001>

<bundles_post_ra>
// kernel: tpu_custom_call.1
= control target key start
LH: loop header
LB: loop body
LE: loop exit
PB: predicated region body
PF: predicated region fallthrough
CT: control target
= control target key end

     0   :  { %14 = vsyncpa [#allocation3], 0  ;;  %s2052_s0 = inlined_call_operand.hbm [shape: f32[8,784], index: 0, kind: input, shape index: {}]   ;;  %s2053_s1 = inlined_call_operand.hbm [shape: bf16[784,256], index: 1, kind: input, shape index: {}]   ;;  %s2054_s2 = inlined_call_operand.vmem [shape: f32[1,256], index: 2, kind: input, shape index: {}]   ;;  %s2055_s3 = inlined_call_operand.hbm [shape: bf16[256,128], index: 3, kind: input, shape index: {}]   ;;  %s2056_s4 = inlined_call_operand.vmem [shape: f32[1,128], index: 4, kind: input, shape index: {}]   ;;  %s2057_s5 = inlined_call_operand.hbm [shape: bf16[128,128], index: 5, kind: input, shape index: {}]   ;;  %s2058_s6 = inlined_call_operand.vmem [shape: f32[1,128], index: 6, kind: input, shape index: {}]   ;;  %s2059_s7 = inlined_call_operand.hbm [shape: bf16[128,128], index: 7, kind: input, shape index: {}]   ;;  %s2060_s8 = inlined_call_operand.vmem [shape: f32[1,128], index: 8, kind: input, shape index: {}]   ;;  %s2061_s9 = inlined_call_operand.hbm [shape: bf16[8,128], index: 9, kind: output, shape index: {}]  }
   0x1   :  { %15 = vsyncpa [#allocation6], 0 }
   0x2   :  { %16 = vsyncpa [#allocation9], 0 }
   0x3   :  { %17 = vsyncpa [#allocation4], 0  ;;  %s1878_s30 = smov [#allocation5]   ;;  %s1738_s13 = scalar_lea.hbm %s2053_s1, 12544 }
   0x4   :  { %s33_s10 = sshll.u32 %s1878_s30, 4  ;;  %p1739_p0 = scmp.ne.s32.totalorder %s2053_s1, %s1738_s13  ;;  %s34_s10 = int_to_ptr.vmem [resolvable:$true] %s33_s10 }
   0x5   :  { %p1742_p1 = scmp.lt.u32.totalorder %s1738_s13, %s2053_s1 }
   0x7   :  { %p1744_p2 = pnand %p1742_p1, %p1739_p0 }
   0x9   :  { %1747 = shalt.err (!%p1744_p2)
}
   0xa   :  { %s1748_s18 = scalar_lea.vmem %s34_s10, 12544  ;;  %p1753_p4 = scmp.lt.s32.totalorder %s34_s10, %s34_s10 }
   0xb   :  { %p1749_p3 = scmp.ne.s32.totalorder %s34_s10, %s1748_s18  ;;  %p1754_p5 = scmp.lt.s32.totalorder %s1748_s18, %s1748_s18 }
   0xd   :  { %p1755_p6 = por %p1754_p5, %p1753_p4 }
   0xf   :  { %p1756_p7 = pnand %p1755_p6, %p1749_p3 }
  0x11   :  { %1759 = shalt.err (!%p1756_p7)
}
  0x12   :  { %s1879_s19 = smov 128   ;;  %s1880_s20 = smov 8  }
  0x13   :  { %39 = dma.hbm_to_vmem [thread:$0]  %s2053_s1, 12544, %s34_s10, [#allocation6], %s1879_s19, %s1879_s19, %s1880_s20  }
  0x14   :  { %s1881_s23 = smov [#allocation8]   ;;  %s1882_s25 = smov [#allocation2]  }
  0x15   :  { %s61_s24 = sshll.u32 %s1881_s23, 4  ;;  %s24_s26 = sshll.u32 %s1882_s25, 4  ;;  %s62_s24 = int_to_ptr.vmem [resolvable:$true] %s61_s24  ;;  %s25_s26 = int_to_ptr.vmem [resolvable:$true] %s24_s26 }
  0x16   :  { %s1760_s29 = scalar_lea.hbm %s2057_s5, 1024 }
  0x17   :  { %p1761_p8 = scmp.ne.s32.totalorder %s2057_s5, %s1760_s29  ;;  %p1764_p9 = scmp.lt.u32.totalorder %s1760_s29, %s2057_s5 }
  0x19   :  { %p1766_p10 = pnand %p1764_p9, %p1761_p8 }
  0x1b   :  { %1769 = shalt.err (!%p1766_p10)
}
  0x1c   :  { %s1770_s1 = scalar_lea.vmem %s62_s24, 1024  ;;  %p1775_p12 = scmp.lt.s32.totalorder %s62_s24, %s62_s24 }
  0x1d   :  { %p1771_p11 = scmp.ne.s32.totalorder %s62_s24, %s1770_s1  ;;  %p1776_p13 = scmp.lt.s32.totalorder %s1770_s1, %s1770_s1 }
  0x1f   :  { %p1777_p0 = por %p1776_p13, %p1775_p12 }
  0x21   :  { %p1778_p1 = pnand %p1777_p0, %p1771_p11 }
  0x23   :  { %1781 = shalt.err (!%p1778_p1)
}
  0x24   :  { %s1883_s10 = smov 64   ;;  %s1884_s14 = smov 4  }
  0x25   :  { %67 = dma.hbm_to_vmem [thread:$0]  %s2057_s5, 1024, %s62_s24, [#allocation9], %s1883_s10, %s1883_s10, %s1884_s14  }
  0x26   :  { %s1782_s19 = scalar_lea.hbm %s2052_s0, 896 }
  0x27   :  { %p1783_p2 = scmp.ne.s32.totalorder %s2052_s0, %s1782_s19  ;;  %p1786_p3 = scmp.lt.u32.totalorder %s1782_s19, %s2052_s0 }
  0x29   :  { %p1788_p4 = pnand %p1786_p3, %p1783_p2 }
  0x2b   :  { %1791 = shalt.err (!%p1788_p4)
}
  0x2c   :  { %s1792_s25 = scalar_lea.vmem %s25_s26, 896  ;;  %p1797_p6 = scmp.lt.s32.totalorder %s25_s26, %s25_s26 }
  0x2d   :  { %p1793_p5 = scmp.ne.s32.totalorder %s25_s26, %s1792_s25  ;;  %p1798_p7 = scmp.lt.s32.totalorder %s1792_s25, %s1792_s25 }
  0x2f   :  { %p1799_p8 = por %p1798_p7, %p1797_p6 }
  0x31   :  { %p1800_p9 = pnand %p1799_p8, %p1793_p5 }
  0x33   :  { %1803 = shalt.err (!%p1800_p9)
}
  0x34   :  { %27 = dma.hbm_to_vmem [thread:$0]  %s2052_s0, 896, %s25_s26, [#allocation3]  }
  0x35   :  { %s1885_s27 = smov [#allocation7]   ;;  %s1886_s29 = smov [#allocation10]  }
  0x36   :  { %s47_s28 = sshll.u32 %s1885_s27, 4  ;;  %s75_s30 = sshll.u32 %s1886_s29, 4  ;;  %s48_s28 = int_to_ptr.vmem [resolvable:$true] %s47_s28  ;;  %s76_s30 = int_to_ptr.vmem [resolvable:$true] %s75_s30 }
  0x37   :  { %s1804_s13 = scalar_lea.hbm %s2055_s3, 2048 }
  0x38   :  { %p1805_p10 = scmp.ne.s32.totalorder %s2055_s3, %s1804_s13  ;;  %p1808_p11 = scmp.lt.u32.totalorder %s1804_s13, %s2055_s3 }
  0x3a   :  { %p1810_p12 = pnand %p1808_p11, %p1805_p10 }
  0x3c   :  { %1813 = shalt.err (!%p1810_p12)
}
  0x3d   :  { %s1814_s0 = scalar_lea.vmem %s48_s28, 2048  ;;  %p1819_p0 = scmp.lt.s32.totalorder %s48_s28, %s48_s28 }
  0x3e   :  { %p1815_p13 = scmp.ne.s32.totalorder %s48_s28, %s1814_s0  ;;  %p1820_p1 = scmp.lt.s32.totalorder %s1814_s0, %s1814_s0 }
  0x40   :  { %p1821_p2 = por %p1820_p1, %p1819_p0 }
  0x42   :  { %p1822_p3 = pnand %p1821_p2, %p1815_p13 }
  0x44   :  { %1825 = shalt.err (!%p1822_p3)
}
  0x45   :  { %53 = dma.hbm_to_vmem [thread:$0]  %s2055_s3, 2048, %s48_s28, [#allocation6], %s1883_s10, %s1883_s10, %s1884_s14  }
  0x46   :  { %s1826_s21 = scalar_lea.hbm %s2059_s7, 1024 }
  0x47   :  { %p1827_p4 = scmp.ne.s32.totalorder %s2059_s7, %s1826_s21  ;;  %p1830_p5 = scmp.lt.u32.totalorder %s1826_s21, %s2059_s7 }
  0x49   :  { %p1832_p6 = pnand %p1830_p5, %p1827_p4 }
  0x4b   :  { %1835 = shalt.err (!%p1832_p6)
}
  0x4c   :  { %s1836_s24 = scalar_lea.vmem %s76_s30, 1024  ;;  %p1841_p8 = scmp.lt.s32.totalorder %s76_s30, %s76_s30 }
  0x4d   :  { %p1837_p7 = scmp.ne.s32.totalorder %s76_s30, %s1836_s24  ;;  %p1842_p9 = scmp.lt.s32.totalorder %s1836_s24, %s1836_s24 }
  0x4f   :  { %p1843_p10 = por %p1842_p9, %p1841_p8 }
  0x51   :  { %p1844_p11 = pnand %p1843_p10, %p1837_p7 }
  0x53   :  { %1847 = shalt.err (!%p1844_p11)
}
  0x54   :  { %81 = dma.hbm_to_vmem [thread:$0]  %s2059_s7, 1024, %s76_s30, [#allocation9], %s1883_s10, %s1883_s10, %s1884_s14  }
  0x55   :  { %1870 = dma.done.wait [#allocation3], 896  }
  0x56   :  { %1871 = vsyncadd [#allocation3], 4294966400 }
  0x57   :  { %1872 = dma.done.wait [#allocation6], 14592  }
  0x58   :  { %1873 = vsyncadd [#allocation6], 4294952704 }
  0x59   :  { %1874 = dma.done.wait [#allocation9], 2048  }
  0x5a   :  { %1875 = vsyncadd [#allocation9], 4294965248  ;;  %v1555_v0 = vld [vmem:[#allocation5 + $0x104] ss:$8 sps:$4 sm:$0xff]   ;;  %v1557_v1 = vld [vmem:[#allocation5 + $0x100] ss:$8 sps:$4 sm:$0xff]  }
  0x5b   :  { %759 = vmatprep.subr.bf16.mxu0 %v1555_v0  ;;  %v1558_v2 = vld [vmem:[#allocation5 + $0x114] ss:$8 sps:$4 sm:$0xff]   ;;  %v1560_v3 = vld [vmem:[#allocation5 + $0x110] ss:$8 sps:$4 sm:$0xff]   ;;  %v1561_v4 = vld [vmem:[#allocation5 + $0x124] ss:$8 sps:$4 sm:$0xff]  }
  0x5c   :  { %760 = vmatpush1.bf16.msra.mxu0 %v1557_v1  ;;  %v1563_v5 = vld [vmem:[#allocation5 + $0x120] ss:$8 sps:$4 sm:$0xff]   ;;  %v1564_v6 = vld [vmem:[#allocation5 + $0x134] ss:$8 sps:$4 sm:$0xff]   ;;  %v1566_v7 = vld [vmem:[#allocation5 + $0x130] ss:$8 sps:$4 sm:$0xff]  }
  0x5d   :  { %761 = vmatprep.subr.bf16.mxu0 %v1558_v2  ;;  %v1567_v8 = vld [vmem:[#allocation5 + $0x144] ss:$8 sps:$4 sm:$0xff]   ;;  %v1569_v9 = vld [vmem:[#allocation5 + $0x140] ss:$8 sps:$4 sm:$0xff]   ;;  %v1570_v10 = vld [vmem:[#allocation5 + $0x154] ss:$8 sps:$4 sm:$0xff]  }
  0x5e   :  { %v1572_v11 = vld [vmem:[#allocation5 + $0x150] ss:$8 sps:$4 sm:$0xff]   ;;  %v1573_v12 = vld [vmem:[#allocation5 + $0x164] ss:$8 sps:$4 sm:$0xff]   ;;  %v1575_v15 = vld [vmem:[#allocation5 + $0x160] ss:$8 sps:$4 sm:$0xff]  }
  0x5f   :  { %v103_v13 = vld [vmem:[#allocation2 + $0x18] sm:$0xff]  ;;  %v1576_v16 = vld [vmem:[#allocation5 + $0x174] ss:$8 sps:$4 sm:$0xff]   ;;  %v1578_v18 = vld [vmem:[#allocation5 + $0x170] ss:$8 sps:$4 sm:$0xff]   ;;  %vm714_vm0 = vcmask 130048  }
  0x60   :  { %762 = vmatpush1.bf16.msra.mxu0 %v1560_v3  ;;  %v110_v14 = vpack.c.bf16 %v103_v13, %v103_v13  ;;  %v1609_v17 = vld [vmem:[#allocation5 + $0x4] ss:$8 sps:$4 sm:$0xff]   ;;  %v1614_v20 = vld [vmem:[#allocation5] ss:$8 sps:$4 sm:$0xff]   ;;  %v1615_v21 = vld [vmem:[#allocation5 + $0x14] ss:$8 sps:$4 sm:$0xff]  }
  0x61   :  { %763 = vmatprep.subr.bf16.mxu0 %v1561_v4  ;;  %v1579_v19 = vld [vmem:[#allocation5 + $0x184] ss:$8 sps:$4 sm:$0xff]   ;;  %718 = vmatprep.subr.bf16.mxu1 %v1609_v17  ;;  %v1620_v22 = vld [vmem:[#allocation5 + $0x10] ss:$8 sps:$4 sm:$0xff]   ;;  %v1581_v24 = vld [vmem:[#allocation5 + $0x180] ss:$8 sps:$4 sm:$0xff]  }
  0x62   :  { %791 = vmatprep.mubr.bf16.mxu0 %v110_v14  ;;  %719 = vmatpush1.bf16.msra.mxu1 %v1614_v20  ;;  %v1621_v23 = vld [vmem:[#allocation5 + $0x24] ss:$8 sps:$4 sm:$0xff]   ;;  %v1582_v25 = vld [vmem:[#allocation5 + $0x194] ss:$8 sps:$4 sm:$0xff]   ;;  %v1626_v26 = vld [vmem:[#allocation5 + $0x20] ss:$8 sps:$4 sm:$0xff]  }
  0x63   :  { %720 = vmatprep.subr.bf16.mxu1 %v1615_v21  ;;  %v1627_v27 = vld [vmem:[#allocation5 + $0x34] ss:$8 sps:$4 sm:$0xff]   ;;  %v1584_v28 = vld [vmem:[#allocation5 + $0x190] ss:$8 sps:$4 sm:$0xff]   ;;  %v1585_v29 = vld [vmem:[#allocation5 + $0x1a4] ss:$8 sps:$4 sm:$0xff]  }
  0x64   :  { %764 = vmatpush1.bf16.msra.mxu0 %v1563_v5  ;;  %v1632_v30 = vld [vmem:[#allocation5 + $0x30] ss:$8 sps:$4 sm:$0xff]   ;;  %v1633_v31 = vld [vmem:[#allocation5 + $0x44] ss:$8 sps:$4 sm:$0xff]   ;;  %v1587_v32 = vld [vmem:[#allocation5 + $0x1a0] ss:$8 sps:$4 sm:$0xff]  }
  0x65   :  { %765 = vmatprep.subr.bf16.mxu0 %v1564_v6  ;;  %v1588_v33 = vld [vmem:[#allocation5 + $0x1b4] ss:$8 sps:$4 sm:$0xff]   ;;  %v1638_v34 = vld [vmem:[#allocation5 + $0x40] ss:$8 sps:$4 sm:$0xff]   ;;  %v1590_v36 = vld [vmem:[#allocation5 + $0x1b0] ss:$8 sps:$4 sm:$0xff]  }
  0x66   :  { %721 = vmatpush1.bf16.msra.mxu1 %v1620_v22  ;;  %v1639_v35 = vld [vmem:[#allocation5 + $0x54] ss:$8 sps:$4 sm:$0xff]   ;;  %v1591_v37 = vld [vmem:[#allocation5 + $0x1c4] ss:$8 sps:$4 sm:$0xff]   ;;  %v1644_v38 = vld [vmem:[#allocation5 + $0x50] ss:$8 sps:$4 sm:$0xff]  }
  0x67   :  { %722 = vmatprep.subr.bf16.mxu1 %v1621_v23  ;;  %v1645_v39 = vld [vmem:[#allocation5 + $0x64] ss:$8 sps:$4 sm:$0xff]   ;;  %v1593_v40 = vld [vmem:[#allocation5 + $0x1c0] ss:$8 sps:$4 sm:$0xff]   ;;  %v1594_v41 = vld [vmem:[#allocation5 + $0x1d4] ss:$8 sps:$4 sm:$0xff]  }
  0x68   :  { %766 = vmatpush1.bf16.msra.mxu0 %v1566_v7  ;;  %v1650_v42 = vld [vmem:[#allocation5 + $0x60] ss:$8 sps:$4 sm:$0xff]   ;;  %v1651_v43 = vld [vmem:[#allocation5 + $0x74] ss:$8 sps:$4 sm:$0xff]   ;;  %v1596_v44 = vld [vmem:[#allocation5 + $0x1d0] ss:$8 sps:$4 sm:$0xff]  }
  0x69   :  { %767 = vmatprep.subr.bf16.mxu0 %v1567_v8  ;;  %v1597_v45 = vld [vmem:[#allocation5 + $0x1e4] ss:$8 sps:$4 sm:$0xff]   ;;  %v1656_v46 = vld [vmem:[#allocation5 + $0x70] ss:$8 sps:$4 sm:$0xff]   ;;  %v1599_v48 = vld [vmem:[#allocation5 + $0x1e0] ss:$8 sps:$4 sm:$0xff]  }
  0x6a   :  { %723 = vmatpush1.bf16.msra.mxu1 %v1626_v26  ;;  %v1657_v47 = vld [vmem:[#allocation5 + $0x84] ss:$8 sps:$4 sm:$0xff]   ;;  %v1600_v49 = vld [vmem:[#allocation5 + $0x1f4] ss:$8 sps:$4 sm:$0xff]   ;;  %v1662_v50 = vld [vmem:[#allocation5 + $0x80] ss:$8 sps:$4 sm:$0xff]  }
  0x6b   :  { %724 = vmatprep.subr.bf16.mxu1 %v1627_v27  ;;  %v1602_v51 = vld [vmem:[#allocation5 + $0x1f0] ss:$8 sps:$4 sm:$0xff]   ;;  %v1663_v52 = vld [vmem:[#allocation5 + $0x94] ss:$8 sps:$4 sm:$0xff]   ;;  %v1605_v54 = vld [vmem:[#allocation5 + $0x204] ss:$8 sps:$4 sm:$0xff]  }
  0x6c   :  { %768 = vmatpush1.bf16.msra.mxu0 %v1569_v9  ;;  %v102_v53 = vld [vmem:[#allocation2 + $0x10] sm:$0xff]  ;;  %v1669_v56 = vld [vmem:[#allocation5 + $0xa4] ss:$8 sps:$4 sm:$0xff]   ;;  %v105_v58 = vld [vmem:[#allocation2 + $0x28] sm:$0xff]  ;;  %vm1889_vm1 = vmmov 0  }
  0x6d   :  { %769 = vmatprep.subr.bf16.mxu0 %v1570_v10  ;;  %v1668_v55 = vld [vmem:[#allocation5 + $0x90] ss:$8 sps:$4 sm:$0xff]   ;;  %v109_v57 = vpack.c.bf16 %v102_v53, %v102_v53  ;;  %v1603_v59 = vld [vmem:[#allocation5 + $0x200] ss:$8 sps:$4 sm:$0xff]   ;;  %v112_v60 = vpack.c.bf16 %v105_v58, %v105_v58  ;;  %v1608_v61 = vld [vmem:[#allocation5 + $0x214] ss:$8 sps:$4 sm:$0xff]  }
  0x6e   :  { %725 = vmatpush1.bf16.msra.mxu1 %v1632_v30  ;;  %v1674_v62 = vld [vmem:[#allocation5 + $0xa0] ss:$8 sps:$4 sm:$0xff]   ;;  %v1675_v63 = vld [vmem:[#allocation5 + $0xb4] ss:$8 sps:$4 sm:$0xff]   ;;  %v1606_v1 = vld [vmem:[#allocation5 + $0x210] ss:$8 sps:$4 sm:$0xff]  }
  0x6f   :  { %726 = vmatprep.subr.bf16.mxu1 %v1633_v31  ;;  %v101_v0 = vld [vmem:[#allocation2 + $0x8] sm:$0xff]  ;;  %v1613_v3 = vld [vmem:[#allocation5 + $0x224] ss:$8 sps:$4 sm:$0xff]   ;;  %v1611_v6 = vld [vmem:[#allocation5 + $0x220] ss:$8 sps:$4 sm:$0xff]  }
  0x70   :  { %770 = vmatpush1.bf16.msra.mxu0 %v1572_v11  ;;  %v108_v2 = vpack.c.bf16 %v101_v0, %v101_v0  ;;  %v1680_v4 = vld [vmem:[#allocation5 + $0xb0] ss:$8 sps:$4 sm:$0xff]   ;;  %v1681_v5 = vld [vmem:[#allocation5 + $0xc4] ss:$8 sps:$4 sm:$0xff]   ;;  %v1619_v7 = vld [vmem:[#allocation5 + $0x234] ss:$8 sps:$4 sm:$0xff]  }
  0x71   :  { %771 = vmatprep.subr.bf16.mxu0 %v1573_v12  ;;  %v1686_v8 = vld [vmem:[#allocation5 + $0xc0] ss:$8 sps:$4 sm:$0xff]   ;;  %v1687_v9 = vld [vmem:[#allocation5 + $0xd4] ss:$8 sps:$4 sm:$0xff]   ;;  %v1617_v10 = vld [vmem:[#allocation5 + $0x230] ss:$8 sps:$4 sm:$0xff]  }
  0x72   :  { %727 = vmatpush1.bf16.msra.mxu1 %v1638_v34  ;;  %750 = vmatprep.mubr.bf16.mxu1 %v108_v2  ;;  %v1625_v11 = vld [vmem:[#allocation5 + $0x244] ss:$8 sps:$4 sm:$0xff]   ;;  %v1623_v12 = vld [vmem:[#allocation5 + $0x240] ss:$8 sps:$4 sm:$0xff]   ;;  %v1692_v13 = vld [vmem:[#allocation5 + $0xd0] ss:$8 sps:$4 sm:$0xff]  }
  0x73   :  { %728 = vmatprep.subr.bf16.mxu1 %v1639_v35  ;;  %v1693_v14 = vld [vmem:[#allocation5 + $0xe4] ss:$8 sps:$4 sm:$0xff]   ;;  %v1699_v17 = vld [vmem:[#allocation5 + $0xf4] ss:$8 sps:$4 sm:$0xff]   ;;  %v1701_v20 = vld [vmem:[#allocation5 + $0xf0] ss:$8 sps:$4 sm:$0xff]  }
  0x74   :  { %772 = vmatpush1.bf16.msra.mxu0 %v1575_v15  ;;  %v1631_v15 = vld [vmem:[#allocation5 + $0x254] ss:$8 sps:$4 sm:$0xff]   ;;  %v100_v21 = vld [vmem:[#allocation2] sm:$0xff]  ;;  %v1706_v31 = vld [vmem:[#allocation7 + $0x50] sm:$0xff]  }
  0x75   :  { %773 = vmatprep.subr.bf16.mxu0 %v1576_v16  ;;  %v1698_v16 = vld [vmem:[#allocation5 + $0xe0] ss:$8 sps:$4 sm:$0xff]   ;;  %v1702_v22 = vld [vmem:[#allocation7 + $0x40] sm:$0xff]   ;;  %v107_v26 = vpack.c.bf16 %v100_v21, %v100_v21  ;;  %v1704_v27 = vld [vmem:[#allocation7 + $0x48] sm:$0xff]  }
  0x76   :  { %729 = vmatpush1.bf16.msra.mxu1 %v1644_v38  ;;  %v1635_v23 = vld [vmem:[#allocation5 + $0x260] ss:$8 sps:$4 sm:$0xff]   ;;  %v1705_v30 = vld [vmem:[#allocation7 + $0x8] sm:$0xff]   ;;  %v1697_v53 = vld [vmem:[#allocation5 + $0x304] ss:$8 sps:$4 sm:$0xff]  }
  0x77   :  { %730 = vmatprep.subr.bf16.mxu1 %v1645_v39  ;;  %v1707_v34 = vld [vmem:[#allocation7 + $0x10] sm:$0xff]   ;;  %v1708_v35 = vld [vmem:[#allocation7 + $0x58] sm:$0xff]   ;;  %v1710_v39 = vld [vmem:[#allocation7 + $0x60] sm:$0xff]  }
  0x78   :  { %774 = vmatpush1.bf16.msra.mxu0 %v1578_v18  ;;  %v1629_v18 = vld [vmem:[#allocation5 + $0x250] ss:$8 sps:$4 sm:$0xff]   ;;  %v1709_v38 = vld [vmem:[#allocation7 + $0x18] sm:$0xff]  }
  0x79   :  { %775 = vmatprep.subr.bf16.mxu0 %v1579_v19  ;;  %v1637_v19 = vld [vmem:[#allocation5 + $0x264] ss:$8 sps:$4 sm:$0xff]  }
  0x7a   :  { %731 = vmatpush1.bf16.msra.mxu1 %v1650_v42  ;;  %v1711_v42 = vld [vmem:[#allocation7 + $0x20] sm:$0xff]   ;;  %v1717_v0 = vld [vmem:[#allocation7 + $0x38] sm:$0xff]  }
  0x7b   :  { %732 = vmatprep.subr.bf16.mxu1 %v1651_v43  ;;  %v1665_v43 = vld [vmem:[#allocation5 + $0x2b0] ss:$8 sps:$4 sm:$0xff]  }
  0x7c   :  { %776 = vmatpush1.bf16.msra.mxu0 %v1581_v24  ;;  %v1643_v24 = vld [vmem:[#allocation5 + $0x274] ss:$8 sps:$4 sm:$0xff]  }
  0x7d   :  { %777 = vmatprep.subr.bf16.mxu0 %v1582_v25  ;;  %v1703_v25 = vld [vmem:[#allocation7] sm:$0xff]  }
  0x7e   :  { %733 = vmatpush1.bf16.msra.mxu1 %v1656_v46  ;;  %v1679_v46 = vld [vmem:[#allocation5 + $0x2d4] ss:$8 sps:$4 sm:$0xff]  }
  0x7f   :  { %734 = vmatprep.subr.bf16.mxu1 %v1657_v47  ;;  %v1677_v47 = vld [vmem:[#allocation5 + $0x2d0] ss:$8 sps:$4 sm:$0xff]  }
  0x80   :  { %778 = vmatpush1.bf16.msra.mxu0 %v1584_v28  ;;  %v1641_v28 = vld [vmem:[#allocation5 + $0x270] ss:$8 sps:$4 sm:$0xff]  }
  0x81   :  { %779 = vmatprep.subr.bf16.mxu0 %v1585_v29  ;;  %v1649_v29 = vld [vmem:[#allocation5 + $0x284] ss:$8 sps:$4 sm:$0xff]  }
  0x82   :  { %735 = vmatpush1.bf16.msra.mxu1 %v1662_v50  ;;  %v1691_v50 = vld [vmem:[#allocation5 + $0x2f4] ss:$8 sps:$4 sm:$0xff]  }
  0x83   :  { %736 = vmatprep.subr.bf16.mxu1 %v1663_v52  ;;  %v104_v52 = vld [vmem:[#allocation2 + $0x20] sm:$0xff] }
  0x84   :  { %780 = vmatpush1.bf16.msra.mxu0 %v1587_v32  ;;  %v1647_v32 = vld [vmem:[#allocation5 + $0x280] ss:$8 sps:$4 sm:$0xff]  }
  0x85   :  { %781 = vmatprep.subr.bf16.mxu0 %v1588_v33  ;;  %v1655_v33 = vld [vmem:[#allocation5 + $0x294] ss:$8 sps:$4 sm:$0xff]  }
  0x86   :  { %737 = vmatpush1.bf16.msra.mxu1 %v1668_v55  ;;  %v1695_v55 = vld [vmem:[#allocation5 + $0x300] ss:$8 sps:$4 sm:$0xff]  }
  0x87   :  { %738 = vmatprep.subr.bf16.mxu1 %v1669_v56  ;;  %v1887_v56 = vmov 0  }
  0x88   :  { %782 = vmatpush1.bf16.msra.mxu0 %v1590_v36  ;;  %v1653_v36 = vld [vmem:[#allocation5 + $0x290] ss:$8 sps:$4 sm:$0xff]  }
  0x89   :  { %783 = vmatprep.subr.bf16.mxu0 %v1591_v37  ;;  %v1661_v37 = vld [vmem:[#allocation5 + $0x2a4] ss:$8 sps:$4 sm:$0xff]  }
  0x8a   :  { %739 = vmatpush1.bf16.msra.mxu1 %v1674_v62  ;;  %v1715_v62 = vld [vmem:[#allocation7 + $0x30] sm:$0xff]  }
  0x8b   :  { %740 = vmatprep.subr.bf16.mxu1 %v1675_v63  ;;  %v1716_v63 = vld [vmem:[#allocation7 + $0x78] sm:$0xff]  }
  0x8c   :  { %784 = vmatpush1.bf16.msra.mxu0 %v1593_v40  ;;  %v1659_v40 = vld [vmem:[#allocation5 + $0x2a0] ss:$8 sps:$4 sm:$0xff]  }
  0x8d   :  { %785 = vmatprep.subr.bf16.mxu0 %v1594_v41  ;;  %v1667_v41 = vld [vmem:[#allocation5 + $0x2b4] ss:$8 sps:$4 sm:$0xff]  }
  0x8e   :  { %741 = vmatpush1.bf16.msra.mxu1 %v1680_v4 }
  0x8f   :  { %742 = vmatprep.subr.bf16.mxu1 %v1681_v5 }
  0x90   :  { %786 = vmatpush1.bf16.msra.mxu0 %v1596_v44  ;;  %v1673_v44 = vld [vmem:[#allocation5 + $0x2c4] ss:$8 sps:$4 sm:$0xff]  }
  0x91   :  { %787 = vmatprep.subr.bf16.mxu0 %v1597_v45  ;;  %v1671_v45 = vld [vmem:[#allocation5 + $0x2c0] ss:$8 sps:$4 sm:$0xff]  }
  0x92   :  { %743 = vmatpush1.bf16.msra.mxu1 %v1686_v8 }
  0x93   :  { %744 = vmatprep.subr.bf16.mxu1 %v1687_v9  ;;  %v212_v9 = vld [vmem:[%s2054_s2] sm:$0x3] }
  0x94   :  { %788 = vmatpush1.bf16.msra.mxu0 %v1599_v48  ;;  %v1685_v48 = vld [vmem:[#allocation5 + $0x2e4] ss:$8 sps:$4 sm:$0xff]  }
  0x95   :  { %789 = vmatprep.subr.bf16.mxu0 %v1600_v49  ;;  %v1683_v49 = vld [vmem:[#allocation5 + $0x2e0] ss:$8 sps:$4 sm:$0xff]  }
  0x96   :  { %745 = vmatpush1.bf16.msra.mxu1 %v1692_v13 }
  0x97   :  { %746 = vmatprep.subr.bf16.mxu1 %v1693_v14 }
  0x98   :  { %790 = vmatpush1.bf16.msra.mxu0 %v1602_v51  ;;  %v1689_v51 = vld [vmem:[#allocation5 + $0x2f0] ss:$8 sps:$4 sm:$0xff]  }
  0x99   :  { %800 = vmatprep.subr.bf16.mxu0 %v1605_v54  ;;  %v111_v54 = vpack.c.bf16 %v104_v52, %v104_v52 }
  0x9a   :  { %747 = vmatpush1.bf16.msra.mxu1 %v1698_v16 }
  0x9b   :  { %792 = vmatmul.mubr.bf16.vlgmr.msra.gmra.mrb[0].mxu0 %v109_v57  ;;  %748 = vmatprep.subr.bf16.mxu1 %v1699_v17  ;;  %v106_v57 = vld [vmem:[#allocation2 + $0x30] sm:$0xff] }
  0x9c   :  { %801 = vmatpush1.bf16.msra.mxu0 %v1603_v59  ;;  %832 = vmatprep.mubr.bf16.mxu0 %v112_v60  ;;  %v113_v58 = vpack.c.bf16 %v106_v57, %v106_v57  ;;  %v1712_v59 = vld [vmem:[#allocation7 + $0x68] sm:$0xff]  }
  0x9d   :  { %802 = vmatprep.subr.bf16.mxu0 %v1608_v61  ;;  %v1713_v60 = vld [vmem:[#allocation7 + $0x28] sm:$0xff]   ;;  %v1714_v61 = vld [vmem:[#allocation7 + $0x70] sm:$0xff]  }
  0x9e   :  { %749 = vmatpush1.bf16.msra.mxu1 %v1701_v20 }
  0x9f   :  { %1450 = vmatprep.subr.bf16.mxu1 %v1702_v22 }
  0xa0   :  { %803 = vmatpush1.bf16.msra.mxu0 %v1606_v1  ;;  %v1888_v1 = vmov 0.0  }
  0xa1   :  { %804 = vmatprep.subr.bf16.mxu0 %v1613_v3  ;;  %751 = vmatmul.mubr.bf16.vlgmr.msra.gmra.mrb[0].mxu1 %v107_v26  ;;  %v1719_v26 = vld [vmem:[#allocation8 + $0x8] sm:$0xff]  }
  0xa2   :  { %1451 = vmatpush3.bf16.msra.mxu1 %v1703_v25 }
  0xa3   :  { %1452 = vmatprep.subr.bf16.mxu1 %v1704_v27  ;;  %v1720_v27 = vld [vmem:[#allocation8 + $0x10] sm:$0xff]  }
  0xa4   :  { %805 = vmatpush1.bf16.msra.mxu0 %v1611_v6  ;;  %v214_v6 = vlaneseq }
  0xa5   :  { %806 = vmatprep.subr.bf16.mxu0 %v1619_v7 }
  0xa6   :  { %1453 = vmatpush3.bf16.msra.mxu1 %v1705_v30  ;;  %v215_v7 = vshrl.u32 %v214_v6, 7  ;;  %v1723_v30 = vld [vmem:[#allocation8 + $0x28] sm:$0xff]  }
  0xa7   :  { %1454 = vmatprep.subr.bf16.mxu1 %v1706_v31  ;;  %v1724_v31 = vld [vmem:[#allocation8 + $0x30] sm:$0xff]  }
  0xa8   :  { %807 = vmatpush1.bf16.msra.mxu0 %v1617_v10  ;;  %v216_v8 = vsub.s32 0, %v215_v7  ;;  %v220_v10 = vsub.s32 1, %v215_v7 }
  0xa9   :  { %808 = vmatprep.subr.bf16.mxu0 %v1625_v11 }
  0xaa   :  { %1455 = vmatpush3.bf16.msra.mxu1 %v1707_v34  ;;  %v217_v11 = vrot.slane %v212_v9, %v216_v8  ;;  %v1415_v34 = vld [vmem:[%s2056_s4] ss:$0 sm:$0xff] }
  0xab   :  { %1456 = vmatprep.subr.bf16.mxu1 %v1708_v35 }
  0xac   :  { %809 = vmatpush1.bf16.msra.mxu0 %v1623_v12  ;;  %v221_v12 = vrot.slane %v212_v9, %v220_v10 }
  0xad   :  { %810 = vmatprep.subr.bf16.mxu0 %v1631_v15 }
  0xae   :  { %1457 = vmatpush3.bf16.msra.mxu1 %v1709_v38 }
  0xaf   :  { %1458 = vmatprep.subr.bf16.mxu1 %v1710_v39 }
  0xb0   :  { %811 = vmatpush1.bf16.msra.mxu0 %v1629_v18 }
  0xb1   :  { %812 = vmatprep.subr.bf16.mxu0 %v1637_v19 }
  0xb2   :  { %1459 = vmatpush3.bf16.msra.mxu1 %v1711_v42 }
  0xb3   :  { %1460 = vmatprep.subr.bf16.mxu1 %v1712_v59 }
  0xb4   :  { %813 = vmatpush1.bf16.msra.mxu0 %v1635_v23 }
  0xb5   :  { %814 = vmatprep.subr.bf16.mxu0 %v1643_v24  ;;  %v1718_v24 = vld [vmem:[#allocation8] sm:$0xff]  }
  0xb6   :  { %1461 = vmatpush3.bf16.msra.mxu1 %v1713_v60 }
  0xb7   :  { %1462 = vmatprep.subr.bf16.mxu1 %v1714_v61 }
  0xb8   :  { %815 = vmatpush1.bf16.msra.mxu0 %v1641_v28  ;;  %v1721_v28 = vld [vmem:[#allocation8 + $0x18] sm:$0xff]  }
  0xb9   :  { %816 = vmatprep.subr.bf16.mxu0 %v1649_v29  ;;  %v1722_v29 = vld [vmem:[#allocation8 + $0x20] sm:$0xff]  }
  0xba   :  { %1463 = vmatpush3.bf16.msra.mxu1 %v1715_v62 }
  0xbb   :  { %1464 = vmatprep.subr.bf16.mxu1 %v1716_v63 }
  0xbc   :  { %817 = vmatpush1.bf16.msra.mxu0 %v1647_v32  ;;  %v1725_v32 = vld [vmem:[#allocation8 + $0x38] sm:$0xff]  }
  0xbd   :  { %818 = vmatprep.subr.bf16.mxu0 %v1655_v33 }
  0xbe   :  { %1465 = vmatpush3.bf16.msra.mxu1 %v1717_v0 }
  0xbf   :  { %1490 = vmatprep.subr.bf16.mxu1 %v1888_v1 }
  0xc0   :  { %819 = vmatpush1.bf16.msra.mxu0 %v1653_v36 }
  0xc1   :  { %820 = vmatprep.subr.bf16.mxu0 %v1661_v37 }
  0xc4   :  { %821 = vmatpush1.bf16.msra.mxu0 %v1659_v40 }
  0xc5   :  { %822 = vmatprep.subr.bf16.mxu0 %v1667_v41  ;;  %v1726_v41 = vld [vmem:[#allocation10] sm:$0xff]  }
  0xc8   :  { %823 = vmatpush1.bf16.msra.mxu0 %v1665_v43  ;;  %v1727_v43 = vld [vmem:[#allocation10 + $0x8] sm:$0xff]  }
  0xc9   :  { %824 = vmatprep.subr.bf16.mxu0 %v1673_v44  ;;  %v1728_v44 = vld [vmem:[#allocation10 + $0x10] sm:$0xff]  }
  0xcc   :  { %825 = vmatpush1.bf16.msra.mxu0 %v1671_v45  ;;  %v1729_v45 = vld [vmem:[#allocation10 + $0x18] sm:$0xff]  }
  0xcd   :  { %826 = vmatprep.subr.bf16.mxu0 %v1679_v46  ;;  %v1730_v46 = vld [vmem:[#allocation10 + $0x20] sm:$0xff]  }
  0xd0   :  { %827 = vmatpush1.bf16.msra.mxu0 %v1677_v47  ;;  %v1731_v47 = vld [vmem:[#allocation10 + $0x28] sm:$0xff]  }
  0xd1   :  { %828 = vmatprep.subr.bf16.mxu0 %v1685_v48  ;;  %v1732_v48 = vld [vmem:[#allocation10 + $0x30] sm:$0xff]  }
  0xd4   :  { %829 = vmatpush1.bf16.msra.mxu0 %v1683_v49  ;;  %v1733_v49 = vld [vmem:[#allocation10 + $0x38] sm:$0xff]  }
  0xd5   :  { %830 = vmatprep.subr.bf16.mxu0 %v1691_v50  ;;  %v1432_v50 = vld [vmem:[%s2058_s6] ss:$0 sm:$0xff]  ;;  %s1890_s6 = smov [#allocation11]  }
  0xd6   :  { %s1305_s11 = sshll.u32 %s1890_s6, 4  ;;  %s1306_s11 = int_to_ptr.vmem [resolvable:$true] %s1305_s11 }
  0xd7   :  { %p1853_p13 = scmp.lt.s32.totalorder %s1306_s11, %s1306_s11 }
  0xd8   :  { %831 = vmatpush1.bf16.msra.mxu0 %v1689_v51 }
  0xd9   :  { %841 = vmatprep.subr.bf16.mxu0 %v1697_v53 }
  0xdb   :  { %833 = vmatmul.mubr.bf16.vlgmr.msra.gmra.mrb[0].mxu0 %v111_v54 }
  0xdc   :  { %842 = vmatpush1.bf16.msra.mxu0 %v1695_v55  ;;  %873 = vmatprep.mubr.bf16.mxu0 %v1887_v56 }
  0xe7   :  { %1414 = vmatmul.mubr.msk.bf16.vlgmr.msra.gmra.mrb[0].mxu0 %vm714_vm0, %v113_v58  ;;  %v1441_v58 = vld [vmem:[%s2060_s8] ss:$0 sm:$0xff]  ;;  %s1848_s8 = scalar_lea.vmem %s1306_s11, 64 }
  0xe8   :  { %p1849_p12 = scmp.ne.s32.totalorder %s1306_s11, %s1848_s8  ;;  %p1854_p0 = scmp.lt.s32.totalorder %s1848_s8, %s1848_s8 }
  0xea   :  { %p1855_p1 = por %p1854_p0, %p1853_p13 }
  0xec   :  { %p1856_p2 = pnand %p1855_p1, %p1849_p12 }
 0x174   :  { %v752_v2 = vpop.f32.mrb[0].mxu1 }
 0x175   :  { %v754_v3 = vpop.f32.mrb[1].mxu1  ;;  %v753_v13 = vadd.f32 %v752_v2, %v217_v11 }
 0x176   :  { %v756_v4 = vpop.f32.mrb[2].mxu1  ;;  %v755_v14 = vadd.f32 %v754_v3, %v221_v12 }
 0x177   :  { %v757_v5 = vpop.f32.mrb[3].mxu1 }
 0x1ba   :  { %v875_v15 = vpop.f32.mrb[0].mxu0 }
 0x1bb   :  { %v1531_v16 = vadd.f32 %v875_v15, %v753_v13  ;;  %v877_v17 = vpop.f32.mrb[1].mxu0 }
 0x1bc   :  { %v1533_v18 = vadd.f32 %v877_v17, %v755_v14  ;;  %v879_v19 = vpop.f32.mrb[2].mxu0 }
 0x1bd   :  { %v882_v20 = vmax.f32 %v1531_v16, 0.0  ;;  %v880_v21 = vpop.f32.mrb[3].mxu0 }
 0x1be   :  { %v883_v22 = vmax.f32 %v1533_v18, 0.0 }
 0x1bf   :  { %v884_v25 = vpack.c.bf16 %v882_v20, %v882_v20 }
 0x1c0   :  { %v885_v23 = vpack.c.bf16 %v883_v22, %v883_v22 }
 0x1c2   :  { %1053 = vmatprep.mubr.bf16.mxu1 %v885_v23 }
 0x1c3   :  { %1054 = vmatmul.mubr.bf16.vlgmr.msra.gmra.mrb[4].mxu1 %v884_v25 }
 0x1c4   :  { %1491 = vmatpush3.bf16.msra.mxu1 %v1718_v24  ;;  %1506 = vmatprep.mubr.msk.bf16.mxu1 %vm1889_vm1, %v1888_v1 }
 0x1c5   :  { %1492 = vmatprep.subr.bf16.mxu1 %v1888_v1 }
 0x1c8   :  { %1493 = vmatpush3.bf16.msra.mxu1 %v1719_v26 }
 0x1c9   :  { %1494 = vmatprep.subr.bf16.mxu1 %v1888_v1 }
 0x1cc   :  { %1495 = vmatpush3.bf16.msra.mxu1 %v1720_v27 }
 0x1cd   :  { %1496 = vmatprep.subr.bf16.mxu1 %v1888_v1 }
 0x1d0   :  { %1497 = vmatpush3.bf16.msra.mxu1 %v1721_v28 }
 0x1d1   :  { %1498 = vmatprep.subr.bf16.mxu1 %v1888_v1 }
 0x1d4   :  { %1499 = vmatpush3.bf16.msra.mxu1 %v1722_v29 }
 0x1d5   :  { %1500 = vmatprep.subr.bf16.mxu1 %v1888_v1 }
 0x1d8   :  { %1501 = vmatpush3.bf16.msra.mxu1 %v1723_v30 }
 0x1d9   :  { %1502 = vmatprep.subr.bf16.mxu1 %v1888_v1 }
 0x1dc   :  { %1503 = vmatpush3.bf16.msra.mxu1 %v1724_v31 }
 0x1dd   :  { %1504 = vmatprep.subr.bf16.mxu1 %v1888_v1 }
 0x1e0   :  { %1505 = vmatpush3.bf16.msra.mxu1 %v1725_v32 }
 0x1e1   :  { %1510 = vmatprep.subr.bf16.mxu1 %v1888_v1 }
 0x296   :  { %v1466_v33 = vpop.f32.mrb[4].mxu1 }
 0x297   :  { %v1467_v35 = vpop.f32.mrb[5].mxu1 }
 0x298   :  { %v1468_v36 = vadd.f32 %v1467_v35, %v1466_v33  ;;  %v1469_v37 = vpop.f32.mrb[6].mxu1 }
 0x299   :  { %v1470_v38 = vpop.f32.mrb[7].mxu1 }
 0x29a   :  { %v1056_v39 = vadd.f32 %v1468_v36, %v1415_v34 }
 0x29c   :  { %v1061_v40 = vmax.f32 %v1056_v39, 0.0 }
 0x29e   :  { %v1062_v42 = vpack.c.bf16 %v1061_v40, %v1061_v40 }
 0x2a0   :  { %1507 = vmatmul.mubr.bf16.vlgmr.msra.gmra.mrb[8].mxu1 %v1062_v42 }
 0x2a1   :  { %1511 = vmatpush3.bf16.msra.mxu1 %v1726_v41  ;;  %1526 = vmatprep.mubr.msk.bf16.mxu1 %vm1889_vm1, %v1888_v1 }
 0x2a2   :  { %1512 = vmatprep.subr.bf16.mxu1 %v1888_v1 }
 0x2a5   :  { %1513 = vmatpush3.bf16.msra.mxu1 %v1727_v43 }
 0x2a6   :  { %1514 = vmatprep.subr.bf16.mxu1 %v1888_v1 }
 0x2a9   :  { %1515 = vmatpush3.bf16.msra.mxu1 %v1728_v44 }
 0x2aa   :  { %1516 = vmatprep.subr.bf16.mxu1 %v1888_v1 }
 0x2ad   :  { %1517 = vmatpush3.bf16.msra.mxu1 %v1729_v45 }
 0x2ae   :  { %1518 = vmatprep.subr.bf16.mxu1 %v1888_v1 }
 0x2b1   :  { %1519 = vmatpush3.bf16.msra.mxu1 %v1730_v46 }
 0x2b2   :  { %1520 = vmatprep.subr.bf16.mxu1 %v1888_v1 }
 0x2b5   :  { %1521 = vmatpush3.bf16.msra.mxu1 %v1731_v47 }
 0x2b6   :  { %1522 = vmatprep.subr.bf16.mxu1 %v1888_v1 }
 0x2b9   :  { %1523 = vmatpush3.bf16.msra.mxu1 %v1732_v48 }
 0x2ba   :  { %1524 = vmatprep.subr.bf16.mxu1 %v1888_v1 }
 0x2bd   :  { %1525 = vmatpush3.bf16.msra.mxu1 %v1733_v49 }
 0x373   :  { %v1168_v51 = vpop.f32.mrb[8].mxu1 }
 0x374   :  { %v1169_v52 = vadd.f32 %v1432_v50, %v1168_v51  ;;  %v1508_v53 = vpop.f32.mrb[9].mxu1 }
 0x375   :  { %v1171_v54 = vpop.f32.mrb[10].mxu1 }
 0x376   :  { %v1174_v55 = vmax.f32 %v1169_v52, 0.0  ;;  %v1509_v56 = vpop.f32.mrb[11].mxu1 }
 0x378   :  { %v1175_v57 = vpack.c.bf16 %v1174_v55, %v1174_v55 }
 0x37a   :  { %1527 = vmatmul.mubr.bf16.vlgmr.msra.gmra.mrb[12].mxu1 %v1175_v57 }
 0x44d   :  { %v1281_v59 = vpop.f32.mrb[12].mxu1 }
 0x44e   :  { %v1282_v60 = vadd.f32 %v1441_v58, %v1281_v59  ;;  %v1528_v61 = vpop.f32.mrb[13].mxu1 }
 0x44f   :  { %v1284_v62 = vpop.f32.mrb[14].mxu1 }
 0x450   :  { %1287 = vmax.xlane.f32.xlu0 %v1282_v60  ;;  %v1529_v63 = vpop.f32.mrb[15].mxu1 }
 0x4dd   :  { %v1288_v0 = vpop.xlane.xlu0 %1287 }
 0x4de   :  { %v1289_v1 = vsub.f32 %v1282_v60, %v1288_v0 }
 0x4e0   :  { %v1290_v2 = vmul.f32 1.442695, %v1289_v1 }
 0x4e2   :  { %1734 = vpow2.f32 %v1290_v2 }
 0x4ec   :  { %v1735_v3 = vpop.eup %1734 }
 0x4ed   :  { %1292 = vadd.xlane.f32.xlu0 %v1735_v3 }
 0x57a   :  { %v1293_v4 = vpop.xlane.xlu0 %1292 }
 0x57b   :  { %1736 = vlog2.f32 %v1293_v4 }
 0x585   :  { %v1737_v5 = vpop.eup %1736 }
 0x586   :  { %v1295_v6 = vmul.f32 0.6931472, %v1737_v5 }
 0x588   :  { %v1296_v7 = vsub.f32 %v1289_v1, %v1295_v6 }
 0x58a   :  { %v1297_v8 = vpack.c.bf16 %v1296_v7, %v1296_v7 }
 0x58c   :  { %1298 = vst [vmem:[#allocation11] sm:$0xf] %v1297_v8 }
 0x58d   :  { %1859 = shalt.err (!%p1856_p2)
}
 0x58e   :  { %s1860_s1 = scalar_lea.hbm %s2061_s9, 64 }
 0x58f   :  { %p1861_p3 = scmp.ne.s32.totalorder %s2061_s9, %s1860_s1  ;;  %p1864_p4 = scmp.lt.u32.totalorder %s1860_s1, %s2061_s9 }
 0x591   :  { %p1866_p5 = pnand %p1864_p4, %p1861_p3 }
 0x593   :  { %1869 = shalt.err (!%p1866_p5)
}
 0x594   :  { %1308 = dma.vmem_to_hbm [thread:$0]  %s1306_s11, 64, %s2061_s9, [#allocation4]  }
 0x595   :  { %1876 = dma.done.wait [#allocation4], 64  }
 0x596   :  { %1877 = vsyncadd [#allocation4], 4294967232 }
 0x597   :  { %1312 = vsyncpa [#allocation3], 1 }
 0x598   :  { %1313 = vsyncpa [#allocation6], 1 }
 0x599   :  { %1314 = vsyncpa [#allocation9], 1 }
 0x59a   :  { %1315 = vsyncpa [#allocation4], 1 }

</bundles_post_ra>
